<compile_context>
chip_gen: v5e
topology: v5e:2x2
jax: 0.10.0
libtpu: 0.0.40
codegen_flags: <defaults>
</compile_context>

<pallas_src>
import functools
import math

import jax
import jax.numpy as jnp
from jax.experimental import pallas as pl
from jax.experimental.pallas import tpu as pltpu


def _mha_kernel(x_ref, wqkv_ref, bqkv_ref, wo_ref, bo_ref, o_ref, *, num_heads):
    # x_ref block: (bb, S, E) -- bb batch elements handled in this grid step.
    bb, S, E = x_ref.shape
    H = num_heads
    hd = E // H
    scale = 1.0 / math.sqrt(hd)

    # Flatten (bb, S, E) -> (bb*S, E): projections become one wide matmul.
    x = x_ref[...].reshape(bb * S, E).astype(jnp.float32)

    # Fused QKV projection: single MXU matmul, N = 3E lanes, f32 accumulation.
    qkv = jnp.dot(x, wqkv_ref[...], preferred_element_type=jnp.float32) + bqkv_ref[0]

    # Split heads with a single reshape+transpose per tensor:
    # (bb*S, E) -> (bb, S, H, hd) -> (bb, H, S, hd) -> (bb*H, S, hd)
    def split_heads(mat):
        return (mat.reshape(bb, S, H, hd)
                   .transpose(0, 2, 1, 3)
                   .reshape(bb * H, S, hd))

    q = split_heads(qkv[:, 0 * E:1 * E]) * scale   # PyTorch scales q by 1/sqrt(hd)
    k = split_heads(qkv[:, 1 * E:2 * E])
    v = split_heads(qkv[:, 2 * E:3 * E])

    # Scores batched over (batch*heads): (bb*H, S, S)
    scores = jnp.einsum('bqd,bkd->bqk', q, k, preferred_element_type=jnp.float32)

    # Numerically stable softmax over keys; reciprocal on the EUP slot.
    m = jnp.max(scores, axis=-1, keepdims=True)
    p = jnp.exp(scores - m)
    p = p * pl.reciprocal(jnp.sum(p, axis=-1, keepdims=True), approx=True)

    # Weighted sum of values: (bb*H, S, hd)
    ctx = jnp.einsum('bqk,bkd->bqd', p, v, preferred_element_type=jnp.float32)

    # Merge heads back: (bb*H, S, hd) -> (bb, S, E) flattened to (bb*S, E)
    ctx = ctx.reshape(bb, H, S, hd).transpose(0, 2, 1, 3).reshape(bb * S, E)

    # Output projection
    out = jnp.dot(ctx, wo_ref[...], preferred_element_type=jnp.float32) + bo_ref[0]
    o_ref[...] = out.reshape(bb, S, E).astype(o_ref.dtype)


def time_aware_self_attention(x, t_emb, params, *, num_heads):
    """x: (B, S, E) float32.  t_emb is unused (matches PyTorch forward)."""
    del t_emb  # module ignores the timestep embedding in forward()
    B, S, E = x.shape
    wqkv_t, bqkv, wo_t, bo = params

    # At most 2 grid steps: one batched chunk per TensorCore on v7x; on
    # v5e/v6e this keeps per-grid-step overhead to (almost) a single step.
    num_blocks = 2 if (B >= 2 and B % 2 == 0) else 1
    bb = B // num_blocks

    kernel = functools.partial(_mha_kernel, num_heads=num_heads)

    # Grid-invariant operands (weights/biases) map to block (0, 0) on every
    # step, so they are DMA'd into VMEM only once.
    # TODO(synk): for large E, mark weight specs pipeline_mode=pl.Buffered(1)
    # and set vmem_limit_bytes (v7x has only 64 MiB VMEM); irrelevant at E=32.
    wqkv_spec = pl.BlockSpec((E, 3 * E), lambda i: (0, 0))
    bqkv_spec = pl.BlockSpec((1, 3 * E), lambda i: (0, 0))
    wo_spec = pl.BlockSpec((E, E), lambda i: (0, 0))
    bo_spec = pl.BlockSpec((1, E), lambda i: (0, 0))

    return pl.pallas_call(
        kernel,
        out_shape=jax.ShapeDtypeStruct((B, S, E), x.dtype),
        grid=(num_blocks,),
        in_specs=[
            pl.BlockSpec((bb, S, E), lambda i: (i, 0, 0)),   # x
            wqkv_spec,                                        # [Wq|Wk|Wv]^T fused
            bqkv_spec,                                        # [bq|bk|bv] fused
            wo_spec,                                          # Wo^T
            bo_spec,                                          # bo
        ],
        out_specs=pl.BlockSpec((bb, S, E), lambda i: (i, 0, 0)),
        compiler_params=pltpu.CompilerParams(
            dimension_semantics=("parallel",)),
    )(x, wqkv_t, bqkv, wo_t, bo)


def init_params(key, embed_dim):
    """Deterministic synthetic init matching nn.MultiheadAttention param shapes:
       in_proj_weight (3E, E), in_proj_bias (3E,), out_proj.weight (E, E),
       out_proj.bias (E,).  Returned fused / pre-transposed for the kernel:
       wqkv_t (E, 3E) s.t. x @ wqkv_t = [q | k | v],  bqkv (1, 3E),
       wo_t (E, E), bo (1, E)."""
    E = embed_dim
    k1, k2 = jax.random.split(key, 2)
    bound = 1.0 / math.sqrt(E)
    in_proj_weight = jax.random.uniform(k1, (3 * E, E), jnp.float32, -bound, bound)
    in_proj_bias = jnp.zeros((3 * E,), jnp.float32)
    out_proj_weight = jax.random.uniform(k2, (E, E), jnp.float32, -bound, bound)
    out_proj_bias = jnp.zeros((E,), jnp.float32)

    # Rows 0:E / E:2E / 2E:3E of in_proj_weight are Wq / Wk / Wv, so the
    # transpose (E, 3E) already has columns laid out as [q | k | v].
    wqkv_t = jnp.asarray(in_proj_weight.T)          # (E, 3E)
    bqkv = in_proj_bias.reshape(1, 3 * E)
    wo_t = jnp.asarray(out_proj_weight.T)           # (E, E)
    bo = out_proj_bias.reshape(1, E)
    return wqkv_t, bqkv, wo_t, bo


if __name__ == "__main__":
    B, S, E, H = 2, 8, 32, 8   # batch, seq, embed_dim, num_heads (head_dim = 4)
    key = jax.random.PRNGKey(0)
    kx, kt, kp = jax.random.split(key, 3)

    x = jax.random.normal(kx, (B, S, E), jnp.float32)
    t_emb = jax.random.normal(kt, (B, E), jnp.float32)   # ignored by forward, per module
    params = init_params(kp, E)

    out = time_aware_self_attention(x, t_emb, params, num_heads=H)
    out = jax.block_until_ready(out)
    assert out.shape == (B, S, E)
    print("KERNEL_OK")
</pallas_src>

<mosaic_0001>
module attributes {stable_mosaic.version = 11 : i64} {
  func.func @_mha_kernel(%arg0: i32, %arg1: memref<1x8x32xf32, #tpu.memory_space<vmem>>, %arg2: memref<32x96xf32, #tpu.memory_space<vmem>>, %arg3: memref<1x96xf32, #tpu.memory_space<vmem>>, %arg4: memref<32x32xf32, #tpu.memory_space<vmem>>, %arg5: memref<1x32xf32, #tpu.memory_space<vmem>>, %arg6: memref<1x8x32xf32, #tpu.memory_space<vmem>>) attributes {dimension_semantics = [#tpu.dimension_semantics<parallel>], iteration_bounds = array<i64: 2>, scalar_prefetch = 0 : i64, scratch_operands = 0 : i64, tpu.core_type = #tpu.core_type<tc>, window_params = [{transform_indices = @transform_0, window_bounds = array<i64: 1, 8, 32>}, {pipeline_mode = #tpu.pipeline_mode<synchronous>, transform_indices = @transform_1, window_bounds = array<i64: 32, 96>}, {pipeline_mode = #tpu.pipeline_mode<synchronous>, transform_indices = @transform_2, window_bounds = array<i64: 1, 96>}, {pipeline_mode = #tpu.pipeline_mode<synchronous>, transform_indices = @transform_3, window_bounds = array<i64: 32, 32>}, {pipeline_mode = #tpu.pipeline_mode<synchronous>, transform_indices = @transform_4, window_bounds = array<i64: 1, 32>}, {transform_indices = @transform_5, window_bounds = array<i64: 1, 8, 32>}]} {
    %c0 = arith.constant 0 : index
    %c0_0 = arith.constant 0 : index
    %c0_1 = arith.constant 0 : index
    %0 = vector.load %arg1[%c0, %c0_0, %c0_1] : memref<1x8x32xf32, #tpu.memory_space<vmem>>, vector<1x8x32xf32>
    %1 = vector.shape_cast %0 : vector<1x8x32xf32> to vector<8x32xf32>
    %c0_2 = arith.constant 0 : index
    %c0_3 = arith.constant 0 : index
    %2 = vector.load %arg2[%c0_2, %c0_3] : memref<32x96xf32, #tpu.memory_space<vmem>>, vector<32x96xf32>
    %cst = arith.constant dense<0.000000e+00> : vector<8x96xf32>
    %3 = tpu.matmul %1, %2, %cst {dimension_numbers = #tpu.dot_dimension_numbers<[1], [0], [0], [1], [0, 0, 1, 1], [], []>} : vector<8x32xf32>, vector<32x96xf32>, vector<8x96xf32> -> vector<8x96xf32>
    %c0_4 = arith.constant 0 : index
    %c0_5 = arith.constant 0 : index
    %4 = vector.load %arg3[%c0_4, %c0_5] : memref<1x96xf32, #tpu.memory_space<vmem>>, vector<1x96xf32>
    %5 = vector.shape_cast %4 : vector<1x96xf32> to vector<96xf32>
    %6 = vector.shape_cast %5 : vector<96xf32> to vector<1x96xf32>
    %7 = vector.broadcast %6 : vector<1x96xf32> to vector<8x96xf32>
    %8 = arith.addf %3, %7 : vector<8x96xf32>
    %9 = vector.extract_strided_slice %8 {offsets = [0, 0], sizes = [8, 32], strides = [1, 1]} : vector<8x96xf32> to vector<8x32xf32>
    %10 = vector.shape_cast %9 : vector<8x32xf32> to vector<1x8x8x4xf32>
    %11 = tpu.transpose %10, [0, 2, 1, 3] : vector<1x8x8x4xf32> -> vector<1x8x8x4xf32>
    %12 = vector.shape_cast %11 : vector<1x8x8x4xf32> to vector<8x8x4xf32>
    %cst_6 = arith.constant 5.000000e-01 : f32
    %13 = vector.broadcast %cst_6 : f32 to vector<8x8x4xf32>
    %14 = arith.mulf %12, %13 : vector<8x8x4xf32>
    %15 = vector.extract_strided_slice %8 {offsets = [0, 32], sizes = [8, 32], strides = [1, 1]} : vector<8x96xf32> to vector<8x32xf32>
    %16 = vector.shape_cast %15 : vector<8x32xf32> to vector<1x8x8x4xf32>
    %17 = tpu.transpose %16, [0, 2, 1, 3] : vector<1x8x8x4xf32> -> vector<1x8x8x4xf32>
    %18 = vector.shape_cast %17 : vector<1x8x8x4xf32> to vector<8x8x4xf32>
    %19 = vector.extract_strided_slice %8 {offsets = [0, 64], sizes = [8, 32], strides = [1, 1]} : vector<8x96xf32> to vector<8x32xf32>
    %20 = vector.shape_cast %19 : vector<8x32xf32> to vector<1x8x8x4xf32>
    %21 = tpu.transpose %20, [0, 2, 1, 3] : vector<1x8x8x4xf32> -> vector<1x8x8x4xf32>
    %22 = vector.shape_cast %21 : vector<1x8x8x4xf32> to vector<8x8x4xf32>
    "tpu.trace_start"() <{level = 10 : i32, message = "bqd,bkd->bqk"}> : () -> ()
    %cst_7 = arith.constant dense<0.000000e+00> : vector<8x8x8xf32>
    %23 = tpu.matmul %14, %18, %cst_7 {dimension_numbers = #tpu.dot_dimension_numbers<[2], [2], [1], [1], [0, 0, 0, 1, 1, 1], [0], [0]>} : vector<8x8x4xf32>, vector<8x8x4xf32>, vector<8x8x8xf32> -> vector<8x8x8xf32>
    "tpu.trace_stop"() : () -> ()
    %cst_8 = arith.constant dense<0xFF800000> : vector<8x8xf32>
    %24 = vector.multi_reduction <maximumf>, %23, %cst_8 [2] : vector<8x8x8xf32> to vector<8x8xf32>
    %25 = vector.shape_cast %24 : vector<8x8xf32> to vector<8x8x1xf32>
    %26 = vector.broadcast %25 : vector<8x8x1xf32> to vector<8x8x8xf32>
    %27 = arith.subf %23, %26 : vector<8x8x8xf32>
    %28 = math.exp %27 : vector<8x8x8xf32>
    %cst_9 = arith.constant dense<0.000000e+00> : vector<8x8xf32>
    %29 = vector.multi_reduction <add>, %28, %cst_9 [2] : vector<8x8x8xf32> to vector<8x8xf32>
    %30 = vector.shape_cast %29 : vector<8x8xf32> to vector<8x8x1xf32>
    %31 = tpu.reciprocal %30 {approx = true} : vector<8x8x1xf32> -> vector<8x8x1xf32>
    %32 = vector.broadcast %31 : vector<8x8x1xf32> to vector<8x8x8xf32>
    %33 = arith.mulf %28, %32 : vector<8x8x8xf32>
    "tpu.trace_start"() <{level = 10 : i32, message = "bqk,bkd->bqd"}> : () -> ()
    %cst_10 = arith.constant dense<0.000000e+00> : vector<8x8x4xf32>
    %34 = tpu.matmul %33, %22, %cst_10 {dimension_numbers = #tpu.dot_dimension_numbers<[2], [1], [1], [2], [0, 0, 0, 1, 1, 2], [0], [0]>} : vector<8x8x8xf32>, vector<8x8x4xf32>, vector<8x8x4xf32> -> vector<8x8x4xf32>
    "tpu.trace_stop"() : () -> ()
    %35 = vector.shape_cast %34 : vector<8x8x4xf32> to vector<1x8x8x4xf32>
    %36 = tpu.transpose %35, [0, 2, 1, 3] : vector<1x8x8x4xf32> -> vector<1x8x8x4xf32>
    %37 = vector.shape_cast %36 : vector<1x8x8x4xf32> to vector<8x32xf32>
    %c0_11 = arith.constant 0 : index
    %c0_12 = arith.constant 0 : index
    %38 = vector.load %arg4[%c0_11, %c0_12] : memref<32x32xf32, #tpu.memory_space<vmem>>, vector<32x32xf32>
    %cst_13 = arith.constant dense<0.000000e+00> : vector<8x32xf32>
    %39 = tpu.matmul %37, %38, %cst_13 {dimension_numbers = #tpu.dot_dimension_numbers<[1], [0], [0], [1], [0, 0, 1, 1], [], []>} : vector<8x32xf32>, vector<32x32xf32>, vector<8x32xf32> -> vector<8x32xf32>
    %c0_14 = arith.constant 0 : index
    %c0_15 = arith.constant 0 : index
    %40 = vector.load %arg5[%c0_14, %c0_15] : memref<1x32xf32, #tpu.memory_space<vmem>>, vector<1x32xf32>
    %41 = vector.shape_cast %40 : vector<1x32xf32> to vector<32xf32>
    %42 = vector.shape_cast %41 : vector<32xf32> to vector<1x32xf32>
    %43 = vector.broadcast %42 : vector<1x32xf32> to vector<8x32xf32>
    %44 = arith.addf %39, %43 : vector<8x32xf32>
    %45 = vector.shape_cast %44 : vector<8x32xf32> to vector<1x8x32xf32>
    %c0_16 = arith.constant 0 : index
    %c0_17 = arith.constant 0 : index
    %c0_18 = arith.constant 0 : index
    %46 = vector.load %arg6[%c0_16, %c0_17, %c0_18] : memref<1x8x32xf32, #tpu.memory_space<vmem>>, vector<1x8x32xf32>
    tpu.vector_store %arg6[%c0_16, %c0_17, %c0_18], %45 {strides = array<i32>} : memref<1x8x32xf32, #tpu.memory_space<vmem>>, vector<1x8x32xf32>,
    return
  }
  func.func @transform_0(%arg0: i32) -> (i32, i32, i32) {
    %c0_i32 = arith.constant 0 : i32
    %c0_i32_0 = arith.constant 0 : i32
    %c0_i32_1 = arith.constant 0 : i32
    return %arg0, %c0_i32, %c0_i32_0 : i32, i32, i32
  }
  func.func @transform_1(%arg0: i32) -> (i32, i32) {
    %c0_i32 = arith.constant 0 : i32
    %c0_i32_0 = arith.constant 0 : i32
    %c0_i32_1 = arith.constant 0 : i32
    return %c0_i32, %c0_i32_0 : i32, i32
  }
  func.func @transform_2(%arg0: i32) -> (i32, i32) {
    %c0_i32 = arith.constant 0 : i32
    %c0_i32_0 = arith.constant 0 : i32
    %c0_i32_1 = arith.constant 0 : i32
    return %c0_i32, %c0_i32_0 : i32, i32
  }
  func.func @transform_3(%arg0: i32) -> (i32, i32) {
    %c0_i32 = arith.constant 0 : i32
    %c0_i32_0 = arith.constant 0 : i32
    %c0_i32_1 = arith.constant 0 : i32
    return %c0_i32, %c0_i32_0 : i32, i32
  }
  func.func @transform_4(%arg0: i32) -> (i32, i32) {
    %c0_i32 = arith.constant 0 : i32
    %c0_i32_0 = arith.constant 0 : i32
    %c0_i32_1 = arith.constant 0 : i32
    return %c0_i32, %c0_i32_0 : i32, i32
  }
  func.func @transform_5(%arg0: i32) -> (i32, i32, i32) {
    %c0_i32 = arith.constant 0 : i32
    %c0_i32_0 = arith.constant 0 : i32
    %c0_i32_1 = arith.constant 0 : i32
    return %arg0, %c0_i32, %c0_i32_0 : i32, i32, i32
  }
}

</mosaic_0001>

<bundles_post_ra>
// kernel: tpu_custom_call.1
= control target key start
LH: loop header
LB: loop body
LE: loop exit
PB: predicated region body
PF: predicated region fallthrough
CT: control target
= control target key end

     0   :  { %10 = vsyncpa [#allocation3], 0  ;;  %s3000_s0 = inlined_call_operand.hbm [shape: f32[2,8,32], index: 0, kind: input, shape index: {}]   ;;  %s3001_s1 = inlined_call_operand.hbm [shape: f32[32,96], index: 1, kind: input, shape index: {}]   ;;  %s3002_s2 = inlined_call_operand.vmem [shape: f32[1,96], index: 2, kind: input, shape index: {}]   ;;  %s3003_s3 = inlined_call_operand.hbm [shape: f32[32,32], index: 3, kind: input, shape index: {}]   ;;  %s3004_s4 = inlined_call_operand.vmem [shape: f32[1,32], index: 4, kind: input, shape index: {}]   ;;  %s3005_s5 = inlined_call_operand.hbm [shape: f32[2,8,32], index: 5, kind: output, shape index: {}]  }
   0x1   :  { %12 = vsyncpa [#allocation3 + $0x1], 0 }
   0x2   :  { %13 = vsyncpa [#allocation6], 0 }
   0x3   :  { %14 = vsyncpa [#allocation4], 0 }
   0x4   :  { %16 = vsyncpa [#allocation4 + $0x1], 0  ;;  %s2339_s18 = smov 0   ;;  %s2341_s19 = smov 0  }
   0x5   :  { %s2343_s20 = smov 0   ;;  %s2345_s21 = smov 0  }
   0x6 LB: > { %s174_s24 = sshll.u32 %s3001_s1, 4  ;;  %s2363_s25 = sadd.s32 4294967295, %s2285_s21   ;;  %s2285_s21 = sphi %s2345_s21, %s3016_s21   ;;  %s2281_s20 = sphi %s2343_s20, %s3015_s20   ;;  %s2277_s19 = sphi %s2341_s19, %s3014_s19   ;;  %s2273_s18 = sphi %s2339_s18, %s3013_s18   ;;  %s175_s24 = int_to_ptr.hbm [resolvable:$true] %s174_s24 }
   0x7   : > { %p1943_p0 = scmp.ge.s32.totalorder %s2285_s21, 1  ;;  %p43_p1 = scmp.eq.s32.totalorder %s2363_s25, 0 }
   0x8   : > { %p163_p2 = scmp.lt.s32.totalorder %s2285_s21, 3  ;;  %s2287_s27 = smov [#allocation5]  }
   0x9   : > { %s176_s28 = sshll.u32 %s2287_s27, 4  ;;  %s191_s6 = sshll.u32 %s3003_s3, 4  ;;  %s177_s28 = int_to_ptr.vmem [resolvable:$true] %s176_s28  ;;  %s192_s6 = int_to_ptr.hbm [resolvable:$true] %s191_s6 }
   0xa   : > { %p2368_p3 = pnand %p1943_p0, %p163_p2  ;;  %s2288_s7 = smov [#allocation7]  }
   0xb   : > { %s193_s8 = sshll.u32 %s2288_s7, 4  ;;  %s2289_s9 = smov 128   ;;  %s194_s8 = int_to_ptr.vmem [resolvable:$true] %s193_s8 }
   0xc   : > { %p1996_p4 = pneg %p2368_p3  ;;  %s2290_s10 = smov 8  }
   0xd   : > { %s1942_s11 = sadd.s32 4294967294, %s2285_s21   ;;  %s2382_s12 = sadd.s32 1, %s2285_s21  }
   0xe   : > { %p1997_p6 = pnand %p1996_p4, %p43_p1  ;;  %s26_s13 = ssub.s32 %s2285_s21, %s2382_s12 }
   0xf   : > { %s29_s14 = sadd.s32 1, %s2281_s20  ;;  %p27_p7 = scmp.eq.s32.totalorder %s26_s13, 0 }
  0x10   : > { %1999 = dma.hbm_to_vmem [thread:$0]  (!%p1997_p6), %s175_s24, 512, %s177_s28, [#allocation6], %s2289_s9, %s2289_s9, %s2290_s10  }
  0x11   : > { %2002 = dma.hbm_to_vmem [thread:$0]  (!%p1997_p6), %s192_s6, 512, %s194_s8, [#allocation6], %s2289_s9, %s2289_s9, %s2290_s10  }
  0x12   : > { %p36_p8 = scmp.ne.s32.totalorder %s2281_s20, %s2277_s19  ;;  %p37_p9 = scmp.eq.s32.totalorder %s2285_s21, 0 }
  0x13   : > { %p42_p10 = scmp.ne.s32.totalorder %s2277_s19, %s2273_s18  ;;  %p150_p13 = scmp.eq.s32.totalorder %s2363_s25, 1 }
  0x14   : > { %s2393_s15 = scalar_select %p27_p7, %s2281_s20, %s29_s14  }
  0x15   : > { %p2395_p11 = por %p37_p9, %p36_p8  ;;  %p2401_p12 = por %p43_p1, %p42_p10 }
  0x16   : > { %p156_p0 = scmp.eq.s32.totalorder %s1942_s11, 1  ;;  %p2013_p2 = scmp.lt.s32.totalorder %s2285_s21, 2 }
  0x17   : > { %s210_s22 = sand.u32 1, %s2281_s20   ;;  %p2408_p4 = por %p150_p13, %p36_p8 }
  0x18   : > { %p2412_p6 = por %p156_p0, %p42_p10  ;;  %s1947_s27 = sshll.u32 %s210_s22, 3 }
  0x19   : > { %s1948_s28 = sshll.u32 %s2285_s21, 3  ;;  %s214_s7 = scalar_lea.vmem [#allocation2], %s1947_s27 }
  0x1a   : > { %s218_s6 = scalar_lea.hbm %s3000_s0, %s1948_s28  ;;  %s222_s8 = sshll.u32 %s214_s7, 4  ;;  %s223_s8 = int_to_ptr.vmem [resolvable:$true] %s222_s8 }
  0x1b   : > { %s220_s9 = sshll.u32 %s218_s6, 4  ;;  %p2422_p7 = pnand %p2013_p2, %p2395_p11  ;;  %s221_s9 = int_to_ptr.hbm [resolvable:$true] %s220_s9 }
  0x1c   : > { %s211_s11 = scalar_lea.sflag [#allocation3], %s210_s22  ;;  %s2185_s13 = sshra.s32 %s221_s9, 4  ;;  %s2186_s13 = int_to_ptr.hbm [resolvable:$true] %s2185_s13 }
  0x1d   : > { %s2187_s14 = scalar_lea.hbm %s2186_s13, 8  ;;  %p2189_p9 = pneg %p2422_p7 }
  0x1e   : > { %p2188_p8 = scmp.ne.s32.totalorder %s2186_s13, %s2187_s14  ;;  %s2192_s29 = scalar_lea.hbm %s3000_s0, 16 }
  0x1f   : > { %p2193_p11 = scmp.lt.s32.totalorder %s2186_s13, %s3000_s0  ;;  %p2194_p0 = scmp.lt.s32.totalorder %s2192_s29, %s2187_s14 }
  0x20   : > { %p2190_p10 = pnand %p2189_p9, %p2188_p8 }
  0x21   : > { %p2195_p2 = por %p2194_p0, %p2193_p11 }
  0x22   : > { %p2191_p13 = pneg %p2190_p10 }
  0x24   : > { %p2196_p5 = pnand %p2195_p2, %p2191_p13 }
  0x26   : > { %2199 = shalt.err (!%p2196_p5)
}
  0x27   : > { %2006 = dma.hbm_to_vmem [thread:$0]  (!%p2422_p7), %s221_s9, 128, %s223_s8, %s211_s11  }
  0x28   : > { %231 = sbr.rel (%p2368_p3) target bundleno = 1289 (0x509), region = 40  ;;  %s2439_s22 = sand.u32 (!%p2368_p3), 1, %s2277_s19  }
  0x29   : > { %s1950_s6 = sshll.u32 (!%p2368_p3), %s2439_s22, 3  ;;  %s234_s7 = scalar_lea.sflag (!%p2368_p3), [#allocation3], %s2439_s22 }
  0x2a   : > { %s237_s13 = scalar_lea.vmem (!%p2368_p3), [#allocation2], %s1950_s6 }
  0x2d   : > { %2260 = dma.done.wait (%p2401_p12), %s234_s7, 128  }
  0x2e   : > { %2262 = vsyncadd (%p2401_p12), %s234_s7, 4294967168 }
  0x2f   : > { %2264 = dma.done.wait (%p43_p1), [#allocation6], 1024  }
  0x30   : > { %2266 = vsyncadd (%p43_p1), [#allocation6], 4294966272  ;;  %v279_v0 = vld [vmem:[#allocation5 + $0x18] sm:$0xff]  ;;  %v278_v1 = vld [vmem:[#allocation5 + $0x10] sm:$0xff]  ;;  %vm284_vm0 = vcmask 261120   ;;  %s2291_s8 = smov 124  }
  0x31   : > { %300 = vmatpush.msra.mxu0 %v279_v0  ;;  %v277_v2 = vld [vmem:[#allocation5 + $0x8] sm:$0xff]  ;;  %v276_v3 = vld [vmem:[#allocation5] sm:$0xff]  ;;  %v275_v4 = vld [vmem:[%s237_s13] sm:$0xff]  ;;  %s2292_s9 = smov 112   ;;  %s2293_s10 = smov 120   ;;  %vm331_vm1 = vcmask 1047556  }
  0x32   : > { %v2091_v5 = vld [vmem:[%s3002_s2] ss:$0 sm:$0xff]  ;;  %s2294_s11 = smov 108   ;;  %s2295_s14 = smov 104   ;;  %v2299_v9 = vmov 1983009808  }
  0x33   : > { %301 = vmatpush.msra.mxu0 %v278_v1  ;;  %s2296_s27 = smov 116   ;;  %s2297_s28 = smov 96   ;;  %v336_v10 = vunpack.c.l.s4 %v2299_v9  ;;  %v2300_v25 = vmov 1934713408   ;;  %vm1059_vm2 = vcmask 31744   ;;  %vm1268_vm3 = vcmask 64512  }
  0x34   : > { %s2298_s29 = smov 100   ;;  %v384_v26 = vunpack.c.l.s4 %v2300_v25  ;;  %s2301_s30 = smov 64   ;;  %vm1795_vm4 = vcmask 97280   ;;  %vm1797_vm5 = vcmask 130048   ;;  %vm1799_vm6 = vcmask 162816  }
  0x35   : > { %302 = vmatpush.msra.mxu0 %v277_v2  ;;  %v2480_v16 = vunpack.c.0.s8 %v336_v10  ;;  %s2302_s16 = smov 16   ;;  %s2303_s7 = smov 4   ;;  %vm1801_vm7 = vcmask 195584   ;;  %vm1803_vm8 = vcmask 228352  }
  0x36   : > { %v2517_v41 = vunpack.c.0.s8 %v384_v26  ;;  %s2304_s13 = smov 12   ;;  %s2305_s26 = smov 8  }
  0x37   : > { %303 = vmatpush.msra.mxu0 %v276_v3  ;;  %s2306_s17 = smov 20  }
  0x38   : > { %1954 = vmatmul.msk.f32.vlgmr.msra.gmra.mxu0 %vm284_vm0, %v275_v4 }
  0xb5   : > { %v305_v6 = vpop.f32.mrf.mxu0 }
  0xb6   : > { %v2457_v7 = vadd.f32 %v2091_v5, %v305_v6 }
  0xb8   : > { %309 = vrot.lane.b32.xlu2 %v2457_v7, %s2291_s8  ;;  %318 = vrot.lane.b32.xlu1 %v2457_v7, %s2292_s9  ;;  %v333_v14 = vrot.slane %v2457_v7, 4  ;;  %s2307_s8 = smov 24   ;;  %s2308_s9 = smov 28  }
  0xb9   : > { %312 = vrot.lane.b32.xlu0 %v2457_v7, %s2293_s10  ;;  %s1981_s10 = sshll.u32 %s2363_s25, 3  ;;  %s1838_s25 = scalar_lea.sflag [#allocation4], %s2439_s22 }
  0xc0   : > { %321 = vrot.lane.b32.xlu2 %v2457_v7, %s2294_s11  ;;  %324 = vrot.lane.b32.xlu1 %v2457_v7, %s2295_s14 }
  0xc1   : > { %315 = vrot.lane.b32.xlu0 %v2457_v7, %s2296_s27  ;;  %s1848_s27 = scalar_lea.hbm %s3005_s5, %s1981_s10 }
  0xc8   : > { %563 = vrot.lane.b32.xlu2 %v2457_v7, %s2297_s28 }
  0xc9   : > { %327 = vrot.lane.b32.xlu0 %v2457_v7, %s2298_s29 }
 0x112   : > { %v2468_v8 = vpop.permute.xlu2 %309 }
 0x113   : > { %v345_v20 = vrot.slane %v2468_v8, 4  ;;  %v2071_v0 = vpack.i.bf16 %v2468_v8, %v2457_v7 }
 0x11a   : > { %v2490_v22 = vpop.permute.xlu2 %321 }
 0x11b   : > { %v369_v46 = vrot.slane %v2490_v22, 4 }
 0x12a   : > { %v2470_v11 = vpop.permute.xlu1 %318 }
 0x12b   : > { %v2472_v12 = vpop.permute.xlu0 %312  ;;  %v357_v23 = vrot.slane %v2470_v11, 4 }
 0x12c   : > { %v330_v13 = vrot.slane %v2472_v12, 4  ;;  %567 = vrot.lane.b32.xlu1 %v2472_v12, %s2297_s28  ;;  %v2076_v15 = vpack.i.bf16 %v2470_v11, %v2472_v12  ;;  %v334_v17 = vsel %vm331_vm1, %v2472_v12, %v333_v14 }
 0x12d   : > { %v342_v19 = vperm.slane %v334_v17, %v2480_v16 }
 0x12e   : > { %v332_v18 = vsel %vm331_vm1, %v330_v13, %v2457_v7 }
 0x12f   : > { %v338_v24 = vperm.slane %v332_v18, %v2480_v16  ;;  %v393_v32 = vrot.slane %v342_v19, 4 }
 0x131   : > { %v381_v36 = vrot.slane %v338_v24, 4 }
 0x132   : > { %v2488_v21 = vpop.permute.xlu1 %324 }
 0x133   : > { %v2494_v27 = vpop.permute.xlu0 %315  ;;  %575 = vrot.lane.b32.xlu2 %v2488_v21, %s2297_s28  ;;  %v355_v28 = vrot.slane %v2488_v21, 4  ;;  %v358_v34 = vsel %vm331_vm1, %v2488_v21, %v357_v23 }
 0x134   : > { %v343_v29 = vrot.slane %v2494_v27, 4  ;;  %v346_v30 = vsel %vm331_vm1, %v2494_v27, %v345_v20  ;;  %571 = vrot.lane.b32.xlu1 %v2470_v11, %s2297_s28  ;;  %569 = vrot.lane.b32.xlu0 %v2494_v27, %s2297_s28  ;;  %v2081_v31 = vpack.i.bf16 %v2490_v22, %v2494_v27  ;;  %v366_v42 = vperm.slane %v358_v34, %v2480_v16 }
 0x135   : > { %v354_v33 = vperm.slane %v346_v30, %v2480_v16  ;;  %v356_v40 = vsel %vm331_vm1, %v355_v28, %v2470_v11 }
 0x136   : > { %v344_v35 = vsel %vm331_vm1, %v343_v29, %v2468_v8  ;;  %v362_v47 = vperm.slane %v356_v40, %v2480_v16  ;;  %v417_v52 = vrot.slane %v366_v42, 4 }
 0x137   : > { %v350_v37 = vperm.slane %v344_v35, %v2480_v16  ;;  %v391_v38 = vrot.slane %v354_v33, 4  ;;  %v394_v39 = vsel %vm331_vm1, %v354_v33, %v393_v32 }
 0x138   : > { %v402_v50 = vperm.slane %v394_v39, %v2517_v41  ;;  %v405_v59 = vrot.slane %v362_v47, 4 }
 0x139   : > { %v379_v43 = vrot.slane %v350_v37, 4  ;;  %v382_v44 = vsel %vm331_vm1, %v350_v37, %v381_v36  ;;  %v392_v45 = vsel %vm331_vm1, %v391_v38, %v342_v19 }
 0x13a   : > { %v390_v53 = vperm.slane %v382_v44, %v2517_v41  ;;  %v398_v56 = vperm.slane %v392_v45, %v2517_v41  ;;  %v441_v61 = vrot.slane %v402_v50, 4 }
 0x13b   : > { %v380_v48 = vsel %vm331_vm1, %v379_v43, %v338_v24  ;;  %v2525_v49 = vpop.permute.xlu0 %327 }
 0x13c   : > { %v367_v51 = vrot.slane %v2525_v49, 4  ;;  %573 = vrot.lane.b32.xlu1 %v2490_v22, %s2297_s28  ;;  %565 = vrot.lane.b32.xlu0 %v2468_v8, %s2297_s28  ;;  %v370_v54 = vsel %vm331_vm1, %v2525_v49, %v369_v46  ;;  %v386_v55 = vperm.slane %v380_v48, %v2517_v41  ;;  %v433_v1 = vrot.slane %v390_v53, 4 }
 0x13d   : > { %577 = vrot.lane.b32.xlu2 %v2525_v49, %s2297_s28  ;;  %v378_v58 = vperm.slane %v370_v54, %v2480_v16  ;;  %v437_v6 = vrot.slane %v398_v56, 4 }
 0x13e   : > { %v368_v57 = vsel %vm331_vm1, %v367_v51, %v2490_v22  ;;  %v429_v5 = vrot.slane %v386_v55, 4 }
 0x13f   : > { %v374_v60 = vperm.slane %v368_v57, %v2480_v16  ;;  %v415_v62 = vrot.slane %v378_v58, 4  ;;  %v418_v63 = vsel %vm331_vm1, %v378_v58, %v417_v52 }
 0x140   : > { %v426_v4 = vperm.slane %v418_v63, %v2517_v41 }
 0x141   : > { %v403_v2 = vrot.slane %v374_v60, 4  ;;  %v406_v3 = vsel %vm331_vm1, %v374_v60, %v405_v59  ;;  %v416_v10 = vsel %vm331_vm1, %v415_v62, %v366_v42 }
 0x142   : > { %v414_v9 = vperm.slane %v406_v3, %v2517_v41  ;;  %v422_v14 = vperm.slane %v416_v10, %v2517_v41  ;;  %v439_v17 = vrot.slane %v426_v4, 4  ;;  %v442_v18 = vsel %vm331_vm1, %v426_v4, %v441_v61 }
 0x143   : > { %v404_v13 = vsel %vm331_vm1, %v403_v2, %v362_v47  ;;  %v479_v20 = vrot.slane %v442_v18, 4 }
 0x144   : > { %v410_v7 = vperm.slane %v404_v13, %v2517_v41  ;;  %v431_v8 = vrot.slane %v414_v9, 4  ;;  %v434_v19 = vsel %vm331_vm1, %v414_v9, %v433_v1  ;;  %2072 = vrot.lane.b32.xlu1 %v2071_v0, %s2301_s30  ;;  %v435_v23 = vrot.slane %v422_v14, 4 }
 0x145   : > { %v438_v24 = vsel %vm331_vm1, %v422_v14, %v437_v6  ;;  %v440_v25 = vsel %vm331_vm1, %v439_v17, %v402_v50  ;;  %v455_v26 = vrot.slane %v434_v19, 4 }
 0x146   : > { %v427_v28 = vrot.slane %v410_v7, 4  ;;  %v481_v29 = vrot.slane %v438_v24, 4  ;;  %v430_v30 = vsel %vm331_vm1, %v410_v7, %v429_v5  ;;  %v432_v32 = vsel %vm331_vm1, %v431_v8, %v390_v53 }
 0x147   : > { %v436_v33 = vsel %vm331_vm1, %v435_v23, %v398_v56  ;;  %v443_v34 = vrot.slane %v432_v32, 4  ;;  %v456_v35 = vsel %vm331_vm1, %v455_v26, %v430_v30  ;;  %v457_v36 = vrot.slane %v430_v30, 4 }
 0x148   : > { %v482_v37 = vsel %vm331_vm1, %v442_v18, %v481_v29  ;;  %v428_v38 = vsel %vm331_vm1, %v427_v28, %v386_v55  ;;  %v462_v39 = vperm.slane %v456_v35, %v2480_v16  ;;  %v467_v40 = vrot.slane %v440_v25, 4 }
 0x149   : > { %v444_v42 = vsel %vm331_vm1, %v443_v34, %v428_v38  ;;  %v445_v43 = vrot.slane %v428_v38, 4  ;;  %v469_v44 = vrot.slane %v436_v33, 4  ;;  %v480_v45 = vsel %vm331_vm1, %v479_v20, %v438_v24 }
 0x14a   : > { %v450_v46 = vperm.slane %v444_v42, %v2480_v16  ;;  %v468_v47 = vsel %vm331_vm1, %v467_v40, %v436_v33  ;;  %v486_v48 = vperm.slane %v480_v45, %v2480_v16  ;;  %v491_v50 = vrot.slane %v462_v39, 4 }
 0x14b   : > { %v474_v51 = vperm.slane %v468_v47, %v2480_v16  ;;  %v446_v52 = vsel %vm331_vm1, %v432_v32, %v445_v43  ;;  %v458_v53 = vsel %vm331_vm1, %v434_v19, %v457_v36  ;;  %v470_v54 = vsel %vm331_vm1, %v440_v25, %v469_v44  ;;  %v564_v43 = vpop.permute.xlu2 %563 }
 0x14c   : > { %v492_v55 = vsel %vm331_vm1, %v491_v50, %v450_v46  ;;  %v515_v56 = vrot.slane %v486_v48, 4  ;;  %v493_v57 = vrot.slane %v450_v46, 4  ;;  %v454_v58 = vperm.slane %v446_v52, %v2480_v16 }
 0x14d   : > { %v498_v59 = vperm.slane %v492_v55, %v2517_v41  ;;  %v517_v60 = vrot.slane %v474_v51, 4  ;;  %v466_v61 = vperm.slane %v458_v53, %v2480_v16  ;;  %v478_v62 = vperm.slane %v470_v54, %v2480_v16 }
 0x14e   : > { %v516_v63 = vsel %vm331_vm1, %v515_v56, %v474_v51  ;;  %v494_v0 = vsel %vm331_vm1, %v462_v39, %v493_v57  ;;  %v490_v1 = vperm.slane %v482_v37, %v2480_v16  ;;  %v505_v2 = vrot.slane %v454_v58, 4 }
 0x14f   : > { %v522_v3 = vperm.slane %v516_v63, %v2517_v41  ;;  %v541_v4 = vrot.slane %v498_v59, 4  ;;  %v502_v5 = vperm.slane %v494_v0, %v2517_v41  ;;  %v518_v6 = vsel %vm331_vm1, %v486_v48, %v517_v60 }
 0x150   : > { %v526_v9 = vperm.slane %v518_v6, %v2517_v41  ;;  %v506_v10 = vsel %vm331_vm1, %v466_v61, %v505_v2  ;;  %v529_v13 = vrot.slane %v478_v62, 4  ;;  %v503_v14 = vrot.slane %v466_v61, 4 }
 0x151   : > { %v2589_v17 = vsel %vm331_vm1, %v522_v3, %v541_v4  ;;  %v539_v18 = vrot.slane %v522_v3, 4  ;;  %v545_v7 = vrot.slane %v502_v5, 4  ;;  %v514_v8 = vperm.slane %v506_v10, %v2517_v41 }
 0x152   : > { %v543_v19 = vrot.slane %v526_v9, 4  ;;  %v530_v20 = vsel %vm331_vm1, %v490_v1, %v529_v13  ;;  %v504_v23 = vsel %vm331_vm1, %v503_v14, %v454_v58  ;;  %v527_v30 = vrot.slane %v490_v1, 4 }
 0x153   : > { %v2595_v24 = vsel %vm331_vm1, %v539_v18, %v498_v59  ;;  %v538_v25 = vperm.slane %v530_v20, %v2517_v41  ;;  %v553_v26 = vrot.slane %v514_v8, 4  ;;  %v510_v28 = vperm.slane %v504_v23, %v2517_v41 }
 0x154   : > { %v2600_v29 = vsel %vm331_vm1, %v543_v19, %v502_v5  ;;  %v2603_v32 = vsel %vm331_vm1, %v526_v9, %v545_v7  ;;  %v528_v35 = vsel %vm331_vm1, %v527_v30, %v478_v62  ;;  %v589_v52 = vrot.slane %v564_v43, 4 }
 0x155   : > { %v551_v33 = vrot.slane %v538_v25, 4  ;;  %v549_v34 = vrot.slane %v510_v28, 4  ;;  %v2607_v36 = vsel %vm331_vm1, %v538_v25, %v553_v26  ;;  %v534_v38 = vperm.slane %v528_v35, %v2517_v41 }
 0x157   : > { %v2610_v37 = vsel %vm331_vm1, %v551_v33, %v514_v8  ;;  %v547_v39 = vrot.slane %v534_v38, 4  ;;  %v2614_v40 = vsel %vm331_vm1, %v534_v38, %v549_v34 }
 0x159   : > { %v2617_v42 = vsel %vm331_vm1, %v547_v39, %v510_v28 }
 0x18d   : > { %v576_v45 = vpop.permute.xlu2 %575 }
 0x18e   : > { %v611_v50 = vrot.slane %v576_v45, 4 }
 0x197   : > { %v578_v54 = vpop.permute.xlu2 %577 }
 0x198   : > { %v623_v59 = vrot.slane %v578_v54, 4 }
 0x19e   : > { %v568_v44 = vpop.permute.xlu1 %567 }
 0x19f   : > { %v587_v46 = vrot.slane %v568_v44, 4  ;;  %v590_v57 = vsel %vm331_vm1, %v568_v44, %v589_v52 }
 0x1a0   : > { %v598_v63 = vperm.slane %v590_v57, %v2480_v16 }
 0x1a1   : > { %v588_v55 = vsel %vm331_vm1, %v587_v46, %v564_v43 }
 0x1a2   : > { %v594_v60 = vperm.slane %v588_v55, %v2480_v16  ;;  %v649_v25 = vrot.slane %v598_v63, 4 }
 0x1a4   : > { %v637_v13 = vrot.slane %v594_v60, 4 }
 0x1a6   : > { %v572_v47 = vpop.permute.xlu1 %571  ;;  %v570_v48 = vpop.permute.xlu0 %569 }
 0x1a7   : > { %v613_v51 = vrot.slane %v572_v47, 4  ;;  %v612_v53 = vsel %vm331_vm1, %v611_v50, %v572_v47  ;;  %v599_v62 = vrot.slane %v570_v48, 4 }
 0x1a8   : > { %v618_v58 = vperm.slane %v612_v53, %v2480_v16 }
 0x1a9   : > { %v614_v56 = vsel %vm331_vm1, %v576_v45, %v613_v51 }
 0x1aa   : > { %v622_v61 = vperm.slane %v614_v56, %v2480_v16  ;;  %v661_v6 = vrot.slane %v618_v58, 4 }
 0x1ac   : > { %v673_v14 = vrot.slane %v622_v61, 4 }
 0x1ae   : > { %v574_v0 = vpop.permute.xlu1 %573  ;;  %v566_v1 = vpop.permute.xlu0 %565 }
 0x1af   : > { %v624_v2 = vsel %vm331_vm1, %v623_v59, %v574_v0  ;;  %v625_v3 = vrot.slane %v574_v0, 4  ;;  %v600_v4 = vsel %vm331_vm1, %v599_v62, %v566_v1  ;;  %v601_v5 = vrot.slane %v566_v1, 4 }
 0x1b0   : > { %v630_v9 = vperm.slane %v624_v2, %v2480_v16  ;;  %v606_v10 = vperm.slane %v600_v4, %v2480_v16 }
 0x1b1   : > { %v626_v18 = vsel %vm331_vm1, %v578_v54, %v625_v3  ;;  %v602_v7 = vsel %vm331_vm1, %v570_v48, %v601_v5 }
 0x1b2   : > { %v634_v8 = vperm.slane %v626_v18, %v2480_v16  ;;  %v659_v19 = vrot.slane %v630_v9, 4  ;;  %v662_v20 = vsel %vm331_vm1, %v630_v9, %v661_v6  ;;  %v610_v23 = vperm.slane %v602_v7, %v2480_v16 }
 0x1b3   : > { %v670_v26 = vperm.slane %v662_v20, %v2517_v41  ;;  %v635_v28 = vrot.slane %v606_v10, 4  ;;  %v638_v30 = vsel %vm331_vm1, %v606_v10, %v637_v13 }
 0x1b4   : > { %v660_v33 = vsel %vm331_vm1, %v659_v19, %v618_v58  ;;  %v671_v34 = vrot.slane %v634_v8, 4  ;;  %v674_v35 = vsel %vm331_vm1, %v634_v8, %v673_v14  ;;  %v646_v38 = vperm.slane %v638_v30, %v2517_v41 }
 0x1b5   : > { %v666_v39 = vperm.slane %v660_v33, %v2517_v41  ;;  %v682_v43 = vperm.slane %v674_v35, %v2517_v41  ;;  %v687_v44 = vrot.slane %v670_v26, 4  ;;  %v636_v45 = vsel %vm331_vm1, %v635_v28, %v594_v60 }
 0x1b6   : > { %v672_v46 = vsel %vm331_vm1, %v671_v34, %v622_v61  ;;  %v642_v47 = vperm.slane %v636_v45, %v2517_v41  ;;  %v647_v48 = vrot.slane %v610_v23, 4  ;;  %v650_v50 = vsel %vm331_vm1, %v610_v23, %v649_v25 }
 0x1b7   : > { %v678_v51 = vperm.slane %v672_v46, %v2517_v41  ;;  %v683_v52 = vrot.slane %v666_v39, 4  ;;  %v695_v53 = vrot.slane %v682_v43, 4  ;;  %v658_v54 = vperm.slane %v650_v50, %v2517_v41 }
 0x1b8   : > { %v648_v55 = vsel %vm331_vm1, %v647_v48, %v598_v63  ;;  %v685_v56 = vrot.slane %v642_v47, 4  ;;  %v688_v57 = vsel %vm331_vm1, %v687_v44, %v646_v38  ;;  %v689_v58 = vrot.slane %v646_v38, 4 }
 0x1b9   : > { %v691_v59 = vrot.slane %v678_v51, 4  ;;  %v654_v60 = vperm.slane %v648_v55, %v2517_v41  ;;  %v684_v61 = vsel %vm331_vm1, %v683_v52, %v642_v47  ;;  %v697_v62 = vrot.slane %v658_v54, 4 }
 0x1ba   : > { %v686_v0 = vsel %vm331_vm1, %v666_v39, %v685_v56  ;;  %v690_v1 = vsel %vm331_vm1, %v670_v26, %v689_v58  ;;  %v699_v2 = vrot.slane %v688_v57, 4  ;;  %v701_v4 = vrot.slane %v684_v61, 4 }
 0x1bb   : > { %v693_v3 = vrot.slane %v654_v60, 4  ;;  %v711_v5 = vrot.slane %v690_v1, 4  ;;  %v692_v63 = vsel %vm331_vm1, %v691_v59, %v654_v60  ;;  %v696_v6 = vsel %vm331_vm1, %v695_v53, %v658_v54 }
 0x1bc   : > { %v698_v9 = vsel %vm331_vm1, %v682_v43, %v697_v62  ;;  %v713_v10 = vrot.slane %v686_v0, 4  ;;  %v700_v14 = vsel %vm331_vm1, %v699_v2, %v684_v61  ;;  %v723_v19 = vrot.slane %v696_v6, 4 }
 0x1bd   : > { %v694_v13 = vsel %vm331_vm1, %v678_v51, %v693_v3  ;;  %v712_v18 = vsel %vm331_vm1, %v711_v5, %v686_v0  ;;  %v706_v7 = vperm.slane %v700_v14, %v2480_v16  ;;  %v725_v20 = vrot.slane %v692_v63, 4 }
 0x1be   : > { %v718_v8 = vperm.slane %v712_v18, %v2480_v16  ;;  %v735_v23 = vrot.slane %v698_v9, 4  ;;  %v737_v25 = vrot.slane %v694_v13, 4  ;;  %v702_v26 = vsel %vm331_vm1, %v688_v57, %v701_v4 }
 0x1bf   : > { %v724_v28 = vsel %vm331_vm1, %v723_v19, %v692_v63  ;;  %v749_v33 = vrot.slane %v706_v7, 4  ;;  %v710_v34 = vperm.slane %v702_v26, %v2480_v16  ;;  %v714_v39 = vsel %vm331_vm1, %v690_v1, %v713_v10 }
 0x1c0   : > { %v747_v30 = vrot.slane %v718_v8, 4  ;;  %v730_v35 = vperm.slane %v724_v28, %v2480_v16  ;;  %v736_v38 = vsel %vm331_vm1, %v735_v23, %v694_v13  ;;  %v726_v43 = vsel %vm331_vm1, %v696_v6, %v725_v20 }
 0x1c1   : > { %v742_v44 = vperm.slane %v736_v38, %v2480_v16  ;;  %v750_v46 = vsel %vm331_vm1, %v718_v8, %v749_v33  ;;  %v722_v47 = vperm.slane %v714_v39, %v2480_v16  ;;  %v734_v52 = vperm.slane %v726_v43, %v2480_v16 }
 0x1c2   : > { %v748_v45 = vsel %vm331_vm1, %v747_v30, %v706_v7  ;;  %v758_v50 = vperm.slane %v750_v46, %v2517_v41  ;;  %v773_v51 = vrot.slane %v730_v35, 4  ;;  %v738_v54 = vsel %vm331_vm1, %v698_v9, %v737_v25 }
 0x1c3   : > { %v754_v48 = vperm.slane %v748_v45, %v2517_v41  ;;  %v771_v53 = vrot.slane %v742_v44, 4  ;;  %v759_v55 = vrot.slane %v722_v47, 4  ;;  %v761_v56 = vrot.slane %v710_v34, 4 }
 0x1c4   : > { %v774_v58 = vsel %vm331_vm1, %v742_v44, %v773_v51  ;;  %v746_v59 = vperm.slane %v738_v54, %v2480_v16  ;;  %v801_v5 = vrot.slane %v758_v50, 4  ;;  %v785_v6 = vrot.slane %v734_v52, 4 }
 0x1c5   : > { %v797_v57 = vrot.slane %v754_v48, 4  ;;  %v772_v60 = vsel %vm331_vm1, %v771_v53, %v730_v35  ;;  %v782_v61 = vperm.slane %v774_v58, %v2517_v41  ;;  %v760_v62 = vsel %vm331_vm1, %v759_v55, %v710_v34 }
 0x1c6   : > { %v762_v0 = vsel %vm331_vm1, %v722_v47, %v761_v56  ;;  %v778_v1 = vperm.slane %v772_v60, %v2517_v41  ;;  %v766_v2 = vperm.slane %v760_v62, %v2517_v41  ;;  %v783_v3 = vrot.slane %v746_v59, 4 }
 0x1c7   : > { %v799_v4 = vrot.slane %v782_v61, 4  ;;  %v770_v63 = vperm.slane %v762_v0, %v2517_v41  ;;  %v786_v8 = vsel %vm331_vm1, %v746_v59, %v785_v6  ;;  %v556_v20 = vmul.f32 0.5, %v2589_v17  ;;  %v2745_v59 = vpop.permute.xlu1 %2072 }
 0x1c8   : > { %v798_v9 = vsel %vm331_vm1, %v778_v1, %v797_v57  ;;  %v795_v10 = vrot.slane %v778_v1, 4  ;;  %v784_v13 = vsel %vm331_vm1, %v783_v3, %v734_v52  ;;  %v805_v14 = vrot.slane %v766_v2, 4 }
 0x1c9   : > { %1957 = vmatpush.xpose.msk.msra.mxu2 %vm1059_vm2, %v798_v9  ;;  %v800_v18 = vsel %vm331_vm1, %v799_v4, %v758_v50  ;;  %v790_v7 = vperm.slane %v784_v13, %v2517_v41  ;;  %v794_v23 = vperm.slane %v786_v8, %v2517_v41  ;;  %v802_v25 = vsel %vm331_vm1, %v782_v61, %v801_v5 }
 0x1ca   : > { %v796_v19 = vsel %vm331_vm1, %v795_v10, %v754_v48  ;;  %1959 = vmatpush.xpose.msk.msra.mxu3 %vm1059_vm2, %v800_v18  ;;  %v809_v30 = vrot.slane %v770_v63, 4  ;;  %v555_v34 = vmul.f32 0.5, %v2595_v24  ;;  %v557_v35 = vmul.f32 0.5, %v2600_v29 }
 0x1cb   : > { %1955 = vmatpush.xpose.msk.msra.mxu1 %vm1059_vm2, %v796_v19  ;;  %v806_v26 = vsel %vm331_vm1, %v790_v7, %v805_v14  ;;  %v803_v28 = vrot.slane %v790_v7, 4  ;;  %v807_v33 = vrot.slane %v794_v23, 4  ;;  %v561_v24 = vmul.f32 0.5, %v2610_v37 }
 0x1cc   : > { %1958 = vmatmul.msk.f32.vlgmr.msra.gmra.mxu2 %vm1059_vm2, %v556_v20  ;;  %v810_v39 = vsel %vm331_vm1, %v794_v23, %v809_v30  ;;  %v559_v29 = vmul.f32 0.5, %v2617_v42  ;;  %v558_v43 = vmul.f32 0.5, %v2603_v32  ;;  %v560_v44 = vmul.f32 0.5, %v2614_v40 }
 0x1cd   : > { %v804_v17 = vsel %vm331_vm1, %v803_v28, %v766_v2  ;;  %v808_v38 = vsel %vm331_vm1, %v807_v33, %v770_v63  ;;  %1960 = vmatmul.msk.f32.vlgmr.msra.gmra.mxu3 %vm1059_vm2, %v557_v35  ;;  %v562_v45 = vmul.f32 0.5, %v2607_v36  ;;  %v2086_v58 = vpack.i.bf16 %v2525_v49, %v2488_v21 }
 0x1ce   : > { %1965 = vmatpush.xpose.msk.msrb.mxu3 %vm1059_vm2, %v806_v26  ;;  %1963 = vmatpush.xpose.msk.msrb.mxu2 %vm1059_vm2, %v804_v17 }
 0x1cf   : > { %1961 = vmatpush.xpose.msk.msrb.mxu1 %vm1059_vm2, %v802_v25  ;;  %1967 = vmatpush.xpose.msk.msrb.mxu0 %vm1059_vm2, %v808_v38 }
 0x1d0   : > { %1956 = vmatmul.msk.f32.vlgmr.msra.gmra.mxu1 %vm1059_vm2, %v555_v34  ;;  %v2074_v34 = vunpack.i.l.bf16 %v2745_v59 }
 0x1d2   : > { %1968 = vmatmul.msk.f32.vlgmr.msrb.gmra.mxu0 %vm1059_vm2, %v561_v24  ;;  %v2075_v24 = vunpack.i.h.bf16 %v2745_v59 }
 0x1d3   : > { %1969 = vmatpush.xpose.msk.msra.mxu1 %vm1059_vm2, %v810_v39 }
 0x1d4   : > { %1964 = vmatmul.msk.f32.vlgmr.msrb.gmra.mxu2 %vm1059_vm2, %v559_v29 }
 0x1d5   : > { %1966 = vmatmul.msk.f32.vlgmr.msrb.gmra.mxu3 %vm1059_vm2, %v560_v44  ;;  %v837_v44 = vrot.slane %v2074_v34, 4 }
 0x1d8   : > { %1962 = vmatmul.msk.f32.vlgmr.msrb.gmra.mxu1 %vm1059_vm2, %v558_v43 }
 0x1e0   : > { %1970 = vmatmul.msk.f32.vlgmr.msra.gmra.mxu1 %vm1059_vm2, %v562_v45 }
 0x24d   : > { %v1083_v37 = vpop.f32.mrf.mxu1 }
 0x24e   : > { %v1269_v46 = vsel %vm1268_vm3, %v1083_v37, -inf }
 0x24f   : > { %1270 = vmax.xlane.f32.xlu0 %v1269_v46  ;;  %v2724_v42 = vpop.f32.mrf.mxu0  ;;  %v1109_v47 = vpop.f32.mrf.mxu2 }
 0x250   : > { %v1287_v32 = vsel %vm1268_vm3, %v2724_v42, -inf  ;;  %v1272_v40 = vsel %vm1268_vm3, %v1109_v47, -inf  ;;  %v1135_v48 = vpop.f32.mrf.mxu3 }
 0x251   : > { %1288 = vmax.xlane.f32.xlu2 %v1287_v32  ;;  %1273 = vmax.xlane.f32.xlu1 %v1272_v40  ;;  %v1275_v51 = vsel %vm1268_vm3, %v1135_v48, -inf  ;;  %v849_v32 = vrot.slane %v2075_v24, 4 }
 0x255   : > { %v1161_v50 = vpop.f32.mrf.mxu1 }
 0x256   : > { %v1278_v36 = vsel %vm1268_vm3, %v1161_v50, -inf }
 0x257   : > { %1279 = vmax.xlane.f32.xlu0 %v1278_v36  ;;  %v1187_v56 = vpop.f32.mrf.mxu2 }
 0x258   : > { %v1213_v52 = vpop.f32.mrf.mxu3  ;;  %v1281_v57 = vsel %vm1268_vm3, %v1187_v56, -inf }
 0x259   : > { %1276 = vmax.xlane.f32.xlu2 %v1275_v51  ;;  %v1284_v53 = vsel %vm1268_vm3, %v1213_v52, -inf }
 0x25a   : > { %1285 = vmax.xlane.f32.xlu1 %v1284_v53 }
 0x25d   : > { %v1265_v54 = vpop.f32.mrf.mxu1 }
 0x25e   : > { %v1290_v55 = vsel %vm1268_vm3, %v1265_v54, -inf }
 0x25f   : > { %1291 = vmax.xlane.f32.xlu0 %v1290_v55 }
 0x261   : > { %1282 = vmax.xlane.f32.xlu2 %v1281_v57 }
 0x273   : > { %2082 = vrot.lane.b32.xlu0 %v2081_v31, %s2301_s30  ;;  %2087 = vrot.lane.b32.xlu1 %v2086_v58, %s2301_s30 }
 0x279   : > { %2077 = vrot.lane.b32.xlu2 %v2076_v15, %s2301_s30  ;;  %s274_s30 = scalar_lea.vmem [#allocation8], %s1950_s6  ;;  %s2235_s6 = scalar_lea.hbm %s3005_s5, 16 }
 0x2c2   : > { %v1271_v60 = vpop.xlane.xlu0 %1270 }
 0x2c3   : > { %v1293_v61 = vsub.f32 %v1083_v37, %v1271_v60 }
 0x2c4   : > { %v1289_v0 = vpop.xlane.xlu2 %1288  ;;  %v1274_v1 = vpop.xlane.xlu1 %1273 }
 0x2c5   : > { %v1301_v62 = vmul.f32 1.442695, %v1293_v61  ;;  %v1294_v22 = vsub.f32 %v1109_v47, %v1274_v1  ;;  %v1299_v19 = vsub.f32 %v2724_v42, %v1289_v0 }
 0x2c7   : > { %2093 = vpow2.f32 %v1301_v62  ;;  %v1303_v27 = vmul.f32 1.442695, %v1294_v22  ;;  %v1313_v28 = vmul.f32 1.442695, %v1299_v19 }
 0x2c9   : > { %2095 = vpow2.f32 %v1303_v27 }
 0x2ca   : > { %v1280_v31 = vpop.xlane.xlu0 %1279 }
 0x2cb   : > { %v1296_v2 = vsub.f32 %v1161_v50, %v1280_v31 }
 0x2cc   : > { %v1277_v3 = vpop.xlane.xlu2 %1276 }
 0x2cd   : > { %v2747_v21 = vpop.eup %2093  ;;  %v1307_v49 = vmul.f32 1.442695, %v1296_v2  ;;  %v1295_v12 = vsub.f32 %v1135_v48, %v1277_v3  ;;  %v1286_v4 = vpop.xlane.xlu1 %1285 }
 0x2ce   : > { %v1317_v11 = vsel %vm1268_vm3, %v2747_v21, 0.0  ;;  %v1298_v63 = vsub.f32 %v1213_v52, %v1286_v4 }
 0x2cf   : > { %1318 = vadd.xlane.f32.xlu0 %v1317_v11  ;;  %v1305_v15 = vmul.f32 1.442695, %v1295_v12  ;;  %v2751_v5 = vpop.eup %2095  ;;  %2097 = vpow2.f32 %v1307_v49 }
 0x2d0   : > { %v1320_v10 = vsel %vm1268_vm3, %v2751_v5, 0.0  ;;  %v1311_v13 = vmul.f32 1.442695, %v1298_v63 }
 0x2d1   : > { %2099 = vpow2.f32 %v1305_v15  ;;  %1321 = vadd.xlane.f32.xlu2 %v1320_v10 }
 0x2d2   : > { %v1292_v6 = vpop.xlane.xlu0 %1291  ;;  %2101 = vpow2.f32 %v1311_v13 }
 0x2d3   : > { %v1300_v9 = vsub.f32 %v1265_v54, %v1292_v6 }
 0x2d4   : > { %v1283_v18 = vpop.xlane.xlu2 %1282 }
 0x2d5   : > { %v1315_v14 = vmul.f32 1.442695, %v1300_v9  ;;  %v1297_v7 = vsub.f32 %v1187_v56, %v1283_v18  ;;  %v2755_v8 = vpop.eup %2097 }
 0x2d6   : > { %v1326_v26 = vsel %vm1268_vm3, %v2755_v8, 0.0 }
 0x2d7   : > { %v2758_v20 = vpop.eup %2099  ;;  %v1309_v23 = vmul.f32 1.442695, %v1297_v7  ;;  %2103 = vpow2.f32 %v1315_v14 }
 0x2d8   : > { %v1323_v25 = vsel %vm1268_vm3, %v2758_v20, 0.0  ;;  %v2764_v33 = vpop.eup %2101 }
 0x2d9   : > { %2105 = vpow2.f32 %v1309_v23  ;;  %1324 = vadd.xlane.f32.xlu1 %v1323_v25  ;;  %1327 = vadd.xlane.f32.xlu2 %v1326_v26  ;;  %v1332_v29 = vsel %vm1268_vm3, %v2764_v33, 0.0 }
 0x2da   : > { %2107 = vpow2.f32 %v1313_v28 }
 0x2dc   : > { %v2078_v30 = vpop.permute.xlu2 %2077 }
 0x2dd   : > { %v2079_v17 = vunpack.i.l.bf16 %v2078_v30  ;;  %v2767_v35 = vpop.eup %2103  ;;  %v2080_v40 = vunpack.i.h.bf16 %v2078_v30 }
 0x2de   : > { %v1338_v45 = vsel %vm1268_vm3, %v2767_v35, 0.0 }
 0x2df   : > { %v2769_v38 = vpop.eup %2105  ;;  %v835_v39 = vrot.slane %v2079_v17, 4  ;;  %v838_v46 = vsel %vm331_vm1, %v2079_v17, %v837_v44  ;;  %v861_v57 = vrot.slane %v2080_v40, 4 }
 0x2e0   : > { %v1329_v43 = vsel %vm1268_vm3, %v2769_v38, 0.0  ;;  %v2780_v47 = vpop.eup %2107  ;;  %v846_v51 = vperm.slane %v838_v46, %v2480_v16 }
 0x2e1   : > { %1333 = vadd.xlane.f32.xlu1 %v1332_v29  ;;  %1330 = vadd.xlane.f32.xlu0 %v1329_v43  ;;  %v836_v37 = vsel %vm331_vm1, %v835_v39, %v2074_v34  ;;  %v1335_v56 = vsel %vm1268_vm3, %v2780_v47, 0.0 }
 0x2e2   : > { %1339 = vadd.xlane.f32.xlu2 %v1338_v45  ;;  %v842_v50 = vperm.slane %v836_v37, %v2480_v16  ;;  %v897_v22 = vrot.slane %v846_v51, 4 }
 0x2e4   : > { %v885_v61 = vrot.slane %v842_v50, 4 }
 0x2e5   : > { %v2083_v42 = vpop.permute.xlu0 %2082  ;;  %v2088_v55 = vpop.permute.xlu1 %2087 }
 0x2e6   : > { %v2084_v48 = vunpack.i.l.bf16 %v2083_v42  ;;  %v2085_v36 = vunpack.i.h.bf16 %v2083_v42  ;;  %v2090_v59 = vunpack.i.h.bf16 %v2088_v55  ;;  %v2089_v60 = vunpack.i.l.bf16 %v2088_v55 }
 0x2e8   : > { %v847_v52 = vrot.slane %v2084_v48, 4  ;;  %v850_v53 = vsel %vm331_vm1, %v2084_v48, %v849_v32  ;;  %v873_v62 = vrot.slane %v2085_v36, 4  ;;  %v871_v27 = vrot.slane %v2090_v59, 4 }
 0x2e9   : > { %v858_v54 = vperm.slane %v850_v53, %v2480_v16  ;;  %1336 = vadd.xlane.f32.xlu0 %v1335_v56  ;;  %v859_v31 = vrot.slane %v2089_v60, 4  ;;  %v862_v2 = vsel %vm331_vm1, %v2089_v60, %v861_v57 }
 0x2ea   : > { %v848_v58 = vsel %vm331_vm1, %v847_v52, %v2075_v24  ;;  %v870_v12 = vperm.slane %v862_v2, %v2480_v16  ;;  %v872_v10 = vsel %vm331_vm1, %v871_v27, %v2085_v36  ;;  %v874_v13 = vsel %vm331_vm1, %v2090_v59, %v873_v62 }
 0x2eb   : > { %v854_v0 = vperm.slane %v848_v58, %v2480_v16  ;;  %v895_v1 = vrot.slane %v858_v54, 4  ;;  %v898_v4 = vsel %vm331_vm1, %v858_v54, %v897_v22  ;;  %v860_v63 = vsel %vm331_vm1, %v859_v31, %v2080_v40 }
 0x2ec   : > { %v866_v9 = vperm.slane %v860_v63, %v2480_v16  ;;  %v878_v7 = vperm.slane %v872_v10, %v2480_v16  ;;  %v906_v19 = vperm.slane %v898_v4, %v2517_v41  ;;  %v882_v23 = vperm.slane %v874_v13, %v2480_v16 }
 0x2ed   : > { %v883_v49 = vrot.slane %v854_v0, 4  ;;  %v886_v3 = vsel %vm331_vm1, %v854_v0, %v885_v61  ;;  %v896_v11 = vsel %vm331_vm1, %v895_v1, %v846_v51  ;;  %v921_v26 = vrot.slane %v870_v12, 4 }
 0x2ee   : > { %v894_v15 = vperm.slane %v886_v3, %v2517_v41  ;;  %v902_v18 = vperm.slane %v896_v11, %v2517_v41  ;;  %v909_v25 = vrot.slane %v866_v9, 4  ;;  %v907_v30 = vrot.slane %v878_v7, 4 }
 0x2ef   : > { %v884_v6 = vsel %vm331_vm1, %v883_v49, %v842_v50  ;;  %v919_v39 = vrot.slane %v882_v23, 4  ;;  %v922_v24 = vsel %vm331_vm1, %v882_v23, %v921_v26  ;;  %v945_v37 = vrot.slane %v906_v19, 4 }
 0x2f0   : > { %v890_v14 = vperm.slane %v884_v6, %v2517_v41  ;;  %v937_v28 = vrot.slane %v894_v15, 4  ;;  %v910_v17 = vsel %vm331_vm1, %v878_v7, %v909_v25  ;;  %v941_v29 = vrot.slane %v902_v18, 4 }
 0x2f1   : > { %v908_v43 = vsel %vm331_vm1, %v907_v30, %v866_v9  ;;  %v918_v44 = vperm.slane %v910_v17, %v2517_v41  ;;  %v930_v45 = vperm.slane %v922_v24, %v2517_v41  ;;  %v920_v42 = vsel %vm331_vm1, %v919_v39, %v870_v12 }
 0x2f2   : > { %v933_v34 = vrot.slane %v890_v14, 4  ;;  %v914_v46 = vperm.slane %v908_v43, %v2517_v41  ;;  %v926_v32 = vperm.slane %v920_v42, %v2517_v41 }
 0x2f3   : > { %v935_v40 = vrot.slane %v918_v44, 4  ;;  %v938_v48 = vsel %vm331_vm1, %v918_v44, %v937_v28  ;;  %v943_v50 = vrot.slane %v930_v45, 4  ;;  %v946_v51 = vsel %vm331_vm1, %v930_v45, %v945_v37 }
 0x2f4   : > { %v931_v36 = vrot.slane %v914_v46, 4  ;;  %v959_v52 = vrot.slane %v938_v48, 4  ;;  %v934_v53 = vsel %vm331_vm1, %v914_v46, %v933_v34  ;;  %v939_v54 = vrot.slane %v926_v32, 4 }
 0x2f5   : > { %v942_v55 = vsel %vm331_vm1, %v926_v32, %v941_v29  ;;  %v944_v56 = vsel %vm331_vm1, %v943_v50, %v906_v19  ;;  %v983_v57 = vrot.slane %v946_v51, 4  ;;  %v936_v61 = vsel %vm331_vm1, %v935_v40, %v894_v15 }
 0x2f6   : > { %v971_v58 = vrot.slane %v944_v56, 4  ;;  %v985_v59 = vrot.slane %v942_v55, 4  ;;  %v932_v60 = vsel %vm331_vm1, %v931_v36, %v890_v14  ;;  %v940_v62 = vsel %vm331_vm1, %v939_v54, %v902_v18 }
 0x2f7   : > { %v947_v0 = vrot.slane %v936_v61, 4  ;;  %v949_v1 = vrot.slane %v932_v60, 4  ;;  %v960_v22 = vsel %vm331_vm1, %v959_v52, %v934_v53  ;;  %v961_v27 = vrot.slane %v934_v53, 4 }
 0x2f8   : > { %v966_v31 = vperm.slane %v960_v22, %v2480_v16  ;;  %v972_v2 = vsel %vm331_vm1, %v971_v58, %v940_v62  ;;  %v973_v49 = vrot.slane %v940_v62, 4  ;;  %v984_v12 = vsel %vm331_vm1, %v983_v57, %v942_v55 }
 0x2f9   : > { %v948_v3 = vsel %vm331_vm1, %v947_v0, %v932_v60  ;;  %v978_v11 = vperm.slane %v972_v2, %v2480_v16  ;;  %v950_v15 = vsel %vm331_vm1, %v936_v61, %v949_v1  ;;  %v990_v63 = vperm.slane %v984_v12, %v2480_v16 }
 0x2fa   : > { %v954_v4 = vperm.slane %v948_v3, %v2480_v16  ;;  %v995_v6 = vrot.slane %v966_v31, 4  ;;  %v958_v9 = vperm.slane %v950_v15, %v2480_v16  ;;  %v962_v10 = vsel %vm331_vm1, %v938_v48, %v961_v27 }
 0x2fb   : > { %v974_v13 = vsel %vm331_vm1, %v944_v56, %v973_v49  ;;  %v986_v14 = vsel %vm331_vm1, %v946_v51, %v985_v59  ;;  %v1021_v18 = vrot.slane %v978_v11, 4  ;;  %v1019_v19 = vrot.slane %v990_v63, 4 }
 0x2fc   : > { %v996_v7 = vsel %vm331_vm1, %v995_v6, %v954_v4  ;;  %v970_v23 = vperm.slane %v962_v10, %v2480_v16  ;;  %v982_v25 = vperm.slane %v974_v13, %v2480_v16  ;;  %v994_v28 = vperm.slane %v986_v14, %v2480_v16 }
 0x2fd   : > { %v1002_v26 = vperm.slane %v996_v7, %v2517_v41  ;;  %v997_v30 = vrot.slane %v954_v4, 4  ;;  %v1022_v34 = vsel %vm331_vm1, %v990_v63, %v1021_v18  ;;  %v1020_v17 = vsel %vm331_vm1, %v1019_v19, %v978_v11 }
 0x2fe   : > { %v1007_v39 = vrot.slane %v970_v23, 4  ;;  %v1030_v24 = vperm.slane %v1022_v34, %v2517_v41  ;;  %v1009_v29 = vrot.slane %v958_v9, 4  ;;  %v1026_v43 = vperm.slane %v1020_v17, %v2517_v41 }
 0x2ff   : > { %v1031_v44 = vrot.slane %v994_v28, 4  ;;  %v1045_v45 = vrot.slane %v1002_v26, 4  ;;  %v998_v37 = vsel %vm331_vm1, %v966_v31, %v997_v30  ;;  %v1033_v55 = vrot.slane %v982_v25, 4 }
 0x300   : > { %v1008_v46 = vsel %vm331_vm1, %v1007_v39, %v958_v9  ;;  %v1006_v42 = vperm.slane %v998_v37, %v2517_v41  ;;  %v1047_v32 = vrot.slane %v1030_v24, 4  ;;  %v1010_v40 = vsel %vm331_vm1, %v970_v23, %v1009_v29 }
 0x301   : > { %v1043_v48 = vrot.slane %v1026_v43, 4  ;;  %v1014_v50 = vperm.slane %v1008_v46, %v2517_v41  ;;  %v1032_v36 = vsel %vm331_vm1, %v1031_v44, %v982_v25  ;;  %v1046_v51 = vsel %vm331_vm1, %v1026_v43, %v1045_v45 }
 0x302   : > { %v1038_v52 = vperm.slane %v1032_v36, %v2517_v41  ;;  %1398 = vmatpush.msra.mxu3 %v1046_v51  ;;  %v1048_v53 = vsel %vm331_vm1, %v1047_v32, %v1006_v42  ;;  %v1018_v54 = vperm.slane %v1010_v40, %v2517_v41  ;;  %v1049_v58 = vrot.slane %v1006_v42, 4 }
 0x303   : > { %v1044_v56 = vsel %vm331_vm1, %v1043_v48, %v1002_v26  ;;  %1421 = vmatpush.msra.mxu0 %v1048_v53  ;;  %v1053_v57 = vrot.slane %v1014_v50, 4  ;;  %v1034_v60 = vsel %vm331_vm1, %v994_v28, %v1033_v55 }
 0x304   : > { %1375 = vmatpush.msra.mxu2 %v1044_v56  ;;  %v1051_v59 = vrot.slane %v1038_v52, 4  ;;  %v1057_v61 = vrot.slane %v1018_v54, 4  ;;  %v1042_v0 = vperm.slane %v1034_v60, %v2517_v41  ;;  %v1050_v1 = vsel %vm331_vm1, %v1030_v24, %v1049_v58 }
 0x305   : > { %v1054_v62 = vsel %vm331_vm1, %v1038_v52, %v1053_v57  ;;  %1444 = vmatpush.msrb.mxu1 %v1050_v1 }
 0x306   : > { %v1052_v22 = vsel %vm331_vm1, %v1051_v59, %v1014_v50  ;;  %1490 = vmatpush.msrb.mxu3 %v1054_v62  ;;  %v1055_v27 = vrot.slane %v1042_v0, 4  ;;  %v1058_v31 = vsel %vm331_vm1, %v1042_v0, %v1057_v61 }
 0x307   : > { %1467 = vmatpush.msrb.mxu2 %v1052_v22  ;;  %1536 = vmatpush.msra.mxu1 %v1058_v31 }
 0x308   : > { %v1056_v2 = vsel %vm331_vm1, %v1055_v27, %v1018_v54 }
 0x309   : > { %1513 = vmatpush.msrb.mxu0 %v1056_v2 }
 0x342   : > { %v1319_v49 = vpop.xlane.xlu0 %1318 }
 0x343   : > { %2109 = vrcp.f32 %v1319_v49 }
 0x344   : > { %v1322_v3 = vpop.xlane.xlu2 %1321 }
 0x345   : > { %2111 = vrcp.f32 %v1322_v3 }
 0x349   : > { %v2110_v11 = vpop.eup %2109 }
 0x34a   : > { %v1349_v12 = vmul.f32 %v2110_v11, %v2747_v21 }
 0x34b   : > { %v2112_v15 = vpop.eup %2111 }
 0x34c   : > { %1971 = vmatmul.msk.f32.vlgmr.msra.gmra.mxu2 %vm1268_vm3, %v1349_v12  ;;  %v1325_v4 = vpop.xlane.xlu1 %1324  ;;  %v1350_v63 = vmul.f32 %v2112_v15, %v2751_v5  ;;  %v1328_v6 = vpop.xlane.xlu2 %1327 }
 0x34d   : > { %2113 = vrcp.f32 %v1325_v4 }
 0x34e   : > { %2115 = vrcp.f32 %v1328_v6  ;;  %1972 = vmatmul.msk.f32.vlgmr.msra.gmra.mxu3 %vm1268_vm3, %v1350_v63 }
 0x353   : > { %v2114_v9 = vpop.eup %2113 }
 0x354   : > { %v2116_v10 = vpop.eup %2115  ;;  %v1351_v13 = vmul.f32 %v2114_v9, %v2758_v20  ;;  %v1334_v14 = vpop.xlane.xlu1 %1333 }
 0x355   : > { %v1331_v18 = vpop.xlane.xlu0 %1330  ;;  %v1352_v7 = vmul.f32 %v2116_v10, %v2755_v8  ;;  %2117 = vrcp.f32 %v1334_v14  ;;  %v1340_v21 = vpop.xlane.xlu2 %1339 }
 0x356   : > { %2119 = vrcp.f32 %v1331_v18  ;;  %1973 = vmatmul.msk.f32.vlgmr.msra.gmra.mxu0 %vm1268_vm3, %v1351_v13 }
 0x357   : > { %2121 = vrcp.f32 %v1340_v21  ;;  %1974 = vmatmul.msk.f32.vlgmr.msrb.gmra.mxu1 %vm1268_vm3, %v1352_v7 }
 0x35b   : > { %v2118_v5 = vpop.eup %2117 }
 0x35c   : > { %v2120_v19 = vpop.eup %2119  ;;  %v1354_v23 = vmul.f32 %v2118_v5, %v2764_v33 }
 0x35d   : > { %v1337_v25 = vpop.xlane.xlu0 %1336  ;;  %v2122_v26 = vpop.eup %2121  ;;  %v1353_v20 = vmul.f32 %v2120_v19, %v2769_v38 }
 0x35e   : > { %2123 = vrcp.f32 %v1337_v25  ;;  %v1356_v28 = vmul.f32 %v2122_v26, %v2767_v35  ;;  %1976 = vmatmul.msk.f32.vlgmr.msrb.gmra.mxu3 %vm1268_vm3, %v1354_v23 }
 0x35f   : > { %1975 = vmatmul.msk.f32.vlgmr.msrb.gmra.mxu2 %vm1268_vm3, %v1353_v20 }
 0x360   : > { %1978 = vmatmul.msk.f32.vlgmr.msra.gmra.mxu1 %vm1268_vm3, %v1356_v28 }
 0x364   : > { %v2124_v8 = vpop.eup %2123 }
 0x365   : > { %v1355_v30 = vmul.f32 %v2124_v8, %v2780_v47 }
 0x367   : > { %1977 = vmatmul.msk.f32.vlgmr.msrb.gmra.mxu0 %vm1268_vm3, %v1355_v30 }
 0x3cf   : > { %v1377_v34 = vpop.f32.mrf.mxu2 }
 0x3d0   : > { %v1543_v38 = vrot.slane %v1377_v34, 4 }
 0x3d1   : > { %v1400_v33 = vpop.f32.mrf.mxu3 }
 0x3d2   : > { %v1555_v39 = vrot.slane %v1400_v33, 4 }
 0x3d3   : > { %v1423_v17 = vpop.f32.mrf.mxu0 }
 0x3d4   : > { %v1446_v24 = vpop.f32.mrf.mxu1  ;;  %v1541_v29 = vrot.slane %v1423_v17, 4  ;;  %v1544_v35 = vsel %vm331_vm1, %v1423_v17, %v1543_v38 }
 0x3d5   : > { %v1553_v43 = vrot.slane %v1446_v24, 4  ;;  %v1556_v45 = vsel %vm331_vm1, %v1446_v24, %v1555_v39  ;;  %v1552_v47 = vperm.slane %v1544_v35, %v2480_v16 }
 0x3d6   : > { %v1542_v37 = vsel %vm331_vm1, %v1541_v29, %v1377_v34  ;;  %v1564_v42 = vperm.slane %v1556_v45, %v2480_v16 }
 0x3d7   : > { %v1554_v44 = vsel %vm331_vm1, %v1553_v43, %v1400_v33  ;;  %v1548_v32 = vperm.slane %v1542_v37, %v2480_v16  ;;  %v1603_v48 = vrot.slane %v1552_v47, 4 }
 0x3d8   : > { %v1560_v46 = vperm.slane %v1554_v44, %v2480_v16  ;;  %v1601_v36 = vrot.slane %v1564_v42, 4 }
 0x3d9   : > { %v1591_v51 = vrot.slane %v1548_v32, 4  ;;  %v1604_v54 = vsel %vm331_vm1, %v1564_v42, %v1603_v48 }
 0x3da   : > { %v1589_v50 = vrot.slane %v1560_v46, 4  ;;  %v1602_v59 = vsel %vm331_vm1, %v1601_v36, %v1552_v47  ;;  %v1612_v27 = vperm.slane %v1604_v54, %v2517_v41 }
 0x3db   : > { %v1592_v0 = vsel %vm331_vm1, %v1560_v46, %v1591_v51  ;;  %v1608_v3 = vperm.slane %v1602_v59, %v2517_v41 }
 0x3dc   : > { %v1590_v58 = vsel %vm331_vm1, %v1589_v50, %v1548_v32  ;;  %v1600_v15 = vperm.slane %v1592_v0, %v2517_v41  ;;  %v1651_v10 = vrot.slane %v1612_v27, 4 }
 0x3dd   : > { %v1538_v40 = vpop.f32.mrf.mxu1  ;;  %v1596_v49 = vperm.slane %v1590_v58, %v2517_v41  ;;  %v1647_v25 = vrot.slane %v1608_v3, 4 }
 0x3de   : > { %v1577_v52 = vrot.slane %v1538_v40, 4  ;;  %v1643_v23 = vrot.slane %v1600_v15, 4 }
 0x3df   : > { %v1639_v7 = vrot.slane %v1596_v49, 4 }
 0x3e1   : > { %v1492_v53 = vpop.f32.mrf.mxu3 }
 0x3e2   : > { %v1469_v55 = vpop.f32.mrf.mxu2  ;;  %v1578_v56 = vsel %vm331_vm1, %v1577_v52, %v1492_v53  ;;  %v1579_v57 = vrot.slane %v1492_v53, 4 }
 0x3e3   : > { %v1567_v60 = vrot.slane %v1469_v55, 4  ;;  %v1584_v61 = vperm.slane %v1578_v56, %v2480_v16 }
 0x3e4   : > { %v1515_v62 = vpop.f32.mrf.mxu0  ;;  %v1580_v1 = vsel %vm331_vm1, %v1538_v40, %v1579_v57 }
 0x3e5   : > { %v1565_v22 = vrot.slane %v1515_v62, 4  ;;  %v1588_v31 = vperm.slane %v1580_v1, %v2480_v16  ;;  %v1568_v2 = vsel %vm331_vm1, %v1515_v62, %v1567_v60  ;;  %v1613_v4 = vrot.slane %v1584_v61, 4 }
 0x3e6   : > { %v1576_v12 = vperm.slane %v1568_v2, %v2480_v16 }
 0x3e7   : > { %v1566_v11 = vsel %vm331_vm1, %v1565_v22, %v1469_v55  ;;  %v1625_v63 = vrot.slane %v1588_v31, 4 }
 0x3e8   : > { %v1572_v6 = vperm.slane %v1566_v11, %v2480_v16  ;;  %v1627_v9 = vrot.slane %v1576_v12, 4 }
 0x3e9   : > { %v1626_v18 = vsel %vm331_vm1, %v1625_v63, %v1576_v12 }
 0x3ea   : > { %v1614_v13 = vsel %vm331_vm1, %v1613_v4, %v1572_v6  ;;  %v1615_v14 = vrot.slane %v1572_v6, 4  ;;  %v1628_v5 = vsel %vm331_vm1, %v1588_v31, %v1627_v9  ;;  %v1632_v19 = vperm.slane %v1626_v18, %v2517_v41 }
 0x3eb   : > { %v1620_v21 = vperm.slane %v1614_v13, %v2517_v41  ;;  %v1636_v20 = vperm.slane %v1628_v5, %v2517_v41 }
 0x3ec   : > { %v1616_v26 = vsel %vm331_vm1, %v1584_v61, %v1615_v14  ;;  %v1645_v34 = vrot.slane %v1632_v19, 4  ;;  %v1648_v33 = vsel %vm331_vm1, %v1632_v19, %v1647_v25 }
 0x3ed   : > { %v1624_v28 = vperm.slane %v1616_v26, %v2517_v41  ;;  %v1637_v8 = vrot.slane %v1620_v21, 4  ;;  %v1640_v30 = vsel %vm331_vm1, %v1620_v21, %v1639_v7  ;;  %v1649_v17 = vrot.slane %v1636_v20, 4 }
 0x3ee   : > { %v1652_v39 = vsel %vm331_vm1, %v1636_v20, %v1651_v10  ;;  %v1667_v24 = vrot.slane %v1640_v30, 4  ;;  %v1646_v43 = vsel %vm331_vm1, %v1645_v34, %v1608_v3  ;;  %v1691_v37 = vrot.slane %v1648_v33, 4 }
 0x3ef   : > { %v1638_v38 = vsel %vm331_vm1, %v1637_v8, %v1596_v49  ;;  %v1641_v29 = vrot.slane %v1624_v28, 4  ;;  %v1689_v35 = vrot.slane %v1652_v39, 4  ;;  %v1650_v44 = vsel %vm331_vm1, %v1649_v17, %v1612_v27 }
 0x3f0   : > { %v1679_v45 = vrot.slane %v1646_v43, 4  ;;  %v1644_v47 = vsel %vm331_vm1, %v1624_v28, %v1643_v23  ;;  %v1655_v42 = vrot.slane %v1638_v38, 4  ;;  %v1692_v51 = vsel %vm331_vm1, %v1652_v39, %v1691_v37  ;;  %v1808_v37 = vld [vmem:[#allocation7 + $0x18] sm:$0xff] }
 0x3f1   : > { %v1642_v46 = vsel %vm331_vm1, %v1641_v29, %v1600_v15  ;;  %v1665_v32 = vrot.slane %v1644_v47, 4  ;;  %v1668_v40 = vsel %vm331_vm1, %v1644_v47, %v1667_v24  ;;  %v1700_v54 = vperm.slane %v1692_v51, %v2480_v16  ;;  %v1807_v47 = vld [vmem:[#allocation7 + $0x10] sm:$0xff]  ;;  %1828 = vmatpush.msra.mxu2 %v1808_v37 }
 0x3f2   : > { %v1653_v48 = vrot.slane %v1642_v46, 4  ;;  %v1676_v50 = vperm.slane %v1668_v40, %v2480_v16  ;;  %v1680_v36 = vsel %vm331_vm1, %v1650_v44, %v1679_v45  ;;  %v1656_v52 = vsel %vm331_vm1, %v1642_v46, %v1655_v42  ;;  %v1806_v46 = vld [vmem:[#allocation7 + $0x8] sm:$0xff] }
 0x3f3   : > { %v1688_v53 = vperm.slane %v1680_v36, %v2480_v16  ;;  %v1666_v55 = vsel %vm331_vm1, %v1665_v32, %v1640_v30  ;;  %v1664_v56 = vperm.slane %v1656_v52, %v2480_v16  ;;  %v1737_v60 = vrot.slane %v1700_v54, 4  ;;  %1829 = vmatpush.msra.mxu2 %v1807_v47 }
 0x3f4   : > { %v1713_v57 = vrot.slane %v1676_v50, 4  ;;  %v1654_v58 = vsel %vm331_vm1, %v1653_v48, %v1638_v38  ;;  %v1672_v59 = vperm.slane %v1666_v55, %v2480_v16  ;;  %v1677_v62 = vrot.slane %v1650_v44, 4 }
 0x3f5   : > { %v1660_v61 = vperm.slane %v1654_v58, %v2480_v16  ;;  %v1690_v0 = vsel %vm331_vm1, %v1689_v35, %v1648_v33  ;;  %v1738_v31 = vsel %vm331_vm1, %v1737_v60, %v1688_v53  ;;  %v1739_v19 = vrot.slane %v1688_v53, 4  ;;  %1830 = vmatpush.msra.mxu2 %v1806_v46 }
 0x3f6   : > { %v1714_v1 = vsel %vm331_vm1, %v1713_v57, %v1664_v56  ;;  %v1696_v22 = vperm.slane %v1690_v0, %v2480_v16  ;;  %v1701_v27 = vrot.slane %v1672_v59, 4  ;;  %v1678_v2 = vsel %vm331_vm1, %v1677_v62, %v1646_v43 }
 0x3f7   : > { %v1703_v49 = vrot.slane %v1660_v61, 4  ;;  %v1744_v3 = vperm.slane %v1738_v31, %v2517_v41  ;;  %v1684_v11 = vperm.slane %v1678_v2, %v2480_v16  ;;  %v1720_v4 = vperm.slane %v1714_v1, %v2517_v41 }
 0x3f8   : > { %v1702_v12 = vsel %vm331_vm1, %v1701_v27, %v1660_v61  ;;  %v1725_v15 = vrot.slane %v1696_v22, 4  ;;  %v1715_v20 = vrot.slane %v1664_v56, 4  ;;  %v1740_v28 = vsel %vm331_vm1, %v1700_v54, %v1739_v19 }
 0x3f9   : > { %v1708_v63 = vperm.slane %v1702_v12, %v2517_v41  ;;  %v1704_v6 = vsel %vm331_vm1, %v1672_v59, %v1703_v49  ;;  %v1757_v9 = vrot.slane %v1744_v3, 4  ;;  %v1727_v14 = vrot.slane %v1684_v11, 4  ;;  %v2092_v59 = vld [vmem:[%s3004_s4] ss:$0 sm:$0xff] }
 0x3fa   : > { %v1726_v10 = vsel %vm331_vm1, %v1725_v15, %v1684_v11  ;;  %v1712_v13 = vperm.slane %v1704_v6, %v2517_v41  ;;  %v1748_v30 = vperm.slane %v1740_v28, %v2517_v41  ;;  %v1759_v17 = vrot.slane %v1720_v4, 4 }
 0x3fb   : > { %v1732_v18 = vperm.slane %v1726_v10, %v2517_v41  ;;  %v1751_v7 = vrot.slane %v1708_v63, 4  ;;  %v1758_v16 = vsel %vm331_vm1, %v1757_v9, %v1720_v4  ;;  %v1728_v21 = vsel %vm331_vm1, %v1696_v22, %v1727_v14 }
 0x3fc   : > { %v1755_v5 = vrot.slane %v1712_v13, 4  ;;  %1778 = vrot.lane.b32.xlu0 %v1758_v16, %s2302_s16  ;;  %v1736_v26 = vperm.slane %v1728_v21, %v2517_v41  ;;  %v1716_v39 = vsel %vm331_vm1, %v1676_v50, %v1715_v20  ;;  %v1761_v24 = vrot.slane %v1748_v30, 4  ;;  %s1850_s16 = sshll.u32 %s274_s30, 4  ;;  %s1851_s16 = int_to_ptr.vmem [resolvable:$true] %s1850_s16 }
 0x3fd   : > { %v1749_v23 = vrot.slane %v1732_v18, 4  ;;  %v1752_v25 = vsel %vm331_vm1, %v1732_v18, %v1751_v7  ;;  %v1724_v29 = vperm.slane %v1716_v39, %v2517_v41  ;;  %v1760_v43 = vsel %vm331_vm1, %v1744_v3, %v1759_v17  ;;  %v1805_v41 = vld [vmem:[#allocation7] sm:$0xff] }
 0x3fe   : > { %1766 = vrot.lane.b32.xlu1 %v1752_v25, %s2303_s7  ;;  %v1756_v8 = vsel %vm331_vm1, %v1736_v26, %v1755_v5  ;;  %v1753_v33 = vrot.slane %v1736_v26, 4  ;;  %1831 = vmatpush.msra.mxu2 %v1805_v41  ;;  %s1852_s7 = sshll.u32 %s1848_s27, 4  ;;  %s1853_s7 = int_to_ptr.hbm [resolvable:$true] %s1852_s7 }
 0x3ff   : > { %v1750_v34 = vsel %vm331_vm1, %v1749_v23, %v1708_v63  ;;  %1774 = vrot.lane.b32.xlu2 %v1756_v8, %s2304_s13  ;;  %v1762_v35 = vsel %vm331_vm1, %v1761_v24, %v1724_v29  ;;  %v1763_v44 = vrot.slane %v1724_v29, 4  ;;  %s2229_s13 = sshra.s32 %s1853_s7, 4  ;;  %s2230_s13 = int_to_ptr.hbm [resolvable:$true] %s2229_s13 }
 0x400   : > { %v1754_v38 = vsel %vm331_vm1, %v1753_v33, %v1712_v13  ;;  %p2236_p12 = scmp.lt.s32.totalorder %s2230_s13, %s3005_s5 }
 0x401   : > { %v1764_v45 = vsel %vm331_vm1, %v1748_v30, %v1763_v44 }
 0x404   : > { %1770 = vrot.lane.b32.xlu0 %v1754_v38, %s2305_s26  ;;  %s2231_s26 = scalar_lea.hbm %s2230_s13, 8 }
 0x405   : > { %p2232_p1 = scmp.ne.s32.totalorder %s2230_s13, %s2231_s26  ;;  %p2237_p7 = scmp.lt.s32.totalorder %s2235_s6, %s2231_s26 }
 0x406   : > { %1782 = vrot.lane.b32.xlu1 %v1760_v43, %s2306_s17 }
 0x407   : > { %1786 = vrot.lane.b32.xlu2 %v1762_v35, %s2307_s8  ;;  %p2233_p3 = pnand %p2232_p1, %p2408_p4  ;;  %p2238_p8 = por %p2237_p7, %p2236_p12 }
 0x409   : > { %p2234_p5 = pneg %p2233_p3 }
 0x40b   : > { %p2239_p9 = pnand %p2238_p8, %p2234_p5 }
 0x40c   : > { %1790 = vrot.lane.b32.xlu0 %v1764_v45, %s2308_s9 }
 0x459   : > { %v1775_v40 = vpop.permute.xlu2 %1774 }
 0x461   : > { %v1787_v55 = vpop.permute.xlu2 %1786 }
 0x46e   : > { %v1779_v42 = vpop.permute.xlu0 %1778 }
 0x470   : > { %v1767_v32 = vpop.permute.xlu1 %1766 }
 0x471   : > { %v1793_v48 = vsel %vm1059_vm2, %v1750_v34, %v1767_v32 }
 0x476   : > { %v1771_v50 = vpop.permute.xlu0 %1770 }
 0x477   : > { %v1794_v36 = vsel %vm1268_vm3, %v1793_v48, %v1771_v50 }
 0x478   : > { %v1796_v51 = vsel %vm1795_vm4, %v1794_v36, %v1775_v40  ;;  %v1783_v52 = vpop.permute.xlu1 %1782 }
 0x479   : > { %v1798_v53 = vsel %vm1797_vm5, %v1796_v51, %v1779_v42 }
 0x47a   : > { %v1800_v54 = vsel %vm1799_vm6, %v1798_v53, %v1783_v52 }
 0x47b   : > { %v1802_v57 = vsel %vm1801_vm7, %v1800_v54, %v1787_v55 }
 0x47e   : > { %v1791_v56 = vpop.permute.xlu0 %1790 }
 0x47f   : > { %v1804_v58 = vsel %vm1803_vm8, %v1802_v57, %v1791_v56 }
 0x480   : > { %1979 = vmatmul.msk.f32.vlgmr.msra.gmra.mxu2 %vm284_vm0, %v1804_v58 }
 0x503   : > { %v1833_v60 = vpop.f32.mrf.mxu2 }
 0x504   : > { %v1834_v61 = vadd.f32 %v2092_v59, %v1833_v60 }
 0x506   : > { %1836 = vst.msk [vmem:[%s274_s30] sm:$0xff] %vm284_vm0, %v1834_v61 }
 0x507   : > { %2242 = shalt.err (!%p2239_p9)
}
 0x508   : > { %1994 = dma.vmem_to_hbm [thread:$0]  (%p2408_p4), %s1851_s16, 128, %s1853_s7, %s1838_s25  }
 0x509 PF: > { %s1864_s22 = sand.u32 1, %s2273_s18   ;;  %p3012_p10 = scmp.ge.s32.totalorder %s2285_s21, 2 }
 0x50a   : > { %s1865_s11 = scalar_lea.sflag [#allocation4], %s1864_s22 }
 0x50b   : > { %p2008_p13 = pnand %p3012_p10, %p2412_p6 }
 0x50d   : > { %p2009_p11 = pneg %p2008_p13 }
 0x50f   : > { %2268 = dma.done.wait (%p2009_p11), %s1865_s11, 128  }
 0x510   : > { %2270 = vsyncadd (%p2009_p11), %s1865_s11, 4294967168  ;;  %p19_p0 = scmp.ge.s32.totalorder %s2382_s12, 4   ;;  %s3013_s18 = smov %s2277_s19 }
 0x511   : > { %s3014_s19 = smov %s2281_s20  ;;  %s3015_s20 = smov %s2393_s15 }
 0x512   : > { %s3016_s21 = smov %s2382_s12  ;;  %21 = sbr.rel (!%p19_p0) target bundleno = 6 (0x6), region = 93 }
 0x517   :  { %1871 = vsyncpa [#allocation3], 1 }
 0x518   :  { %1873 = vsyncpa [#allocation3 + $0x1], 1 }
 0x519   :  { %1874 = vsyncpa [#allocation6], 1 }
 0x51a   :  { %1875 = vsyncpa [#allocation4], 1 }
 0x51b   :  { %1877 = vsyncpa [#allocation4 + $0x1], 1 }

</bundles_post_ra>
